<compile_context>
chip_gen: v6e
topology: v6e:2x2x1
jax: 0.10.0
libtpu: 0.0.40
codegen_flags: <defaults>
</compile_context>

<pallas_src>
import jax
import jax.numpy as jnp
from jax.experimental import pallas as pl
from jax.experimental.pallas import tpu as pltpu

IN_CH, OUT_CH, K = 12, 24, 2
FLAT = OUT_CH * K * K                  # 96 = Cout * KH * KW (valid output columns)
LANES = 128                            # lane-padded width (dense vregs, unmasked vld/vst)
SLAB_ROWS = 32                         # sublane-padded row count ((8,128)-aligned slab)
BIAS_ROW = IN_CH                       # row 12
GATE_ROW = 16                          # rows 16..27 hold the erf gate
TB = 8                                 # batch tile (sublane-aligned)
SQRT_HALF = 0.7071067811865476


# ----------------------------------------------------------------------------- parameter packing
def make_fused_params(weight, bias):
    """One-time precompute of the packed (32, 128) parameter slab.

    rows [0:12)   -> W_mat = weight.reshape(Cin, Cout*K*K), zero-padded to 128 lanes
    row   12      -> bias broadcast over the K*K kernel positions, zero-padded
    rows [13:16)  -> zero
    rows [16:28)  -> gate = erf(W_mat / sqrt(2)) + 0.5 (erf hoisted out of the kernel)
    rows [28:32)  -> zero
    """
    w_mat = weight.reshape(IN_CH, FLAT).astype(jnp.float32)                  # (12, 96)
    b_row = jnp.repeat(bias.astype(jnp.float32), K * K)                      # (96,)
    gate = jax.scipy.special.erf(w_mat * SQRT_HALF) + 0.5                    # (12, 96)
    slab = jnp.zeros((SLAB_ROWS, LANES), jnp.float32)
    slab = slab.at[0:IN_CH, :FLAT].set(w_mat)
    slab = slab.at[BIAS_ROW, :FLAT].set(b_row)
    slab = slab.at[GATE_ROW:GATE_ROW + IN_CH, :FLAT].set(gate)
    return slab


# ----------------------------------------------------------------------------- single-call kernel
def _single_kernel(x_ref, slab_ref, o_ref):
    """Grid-less path for one forward call.

    x_ref:    SMEM (12,) f32 — the single input pixel (N=1, H=W=1).
    slab_ref: VMEM (32, 128) f32 — packed params (see make_fused_params).
    o_ref:    VMEM (12, 128) f32 — columns [0, 96) hold v7 in (Cin, Cout*K*K) layout.
    """
    # v1 = x @ W + b.  With M == 1 the MXU would be <1% utilized, so do the contraction on the
    # VPU.  4 independent partial sums break the 12-deep dependent add chain (co-issue on VALU).
    acc0 = slab_ref[BIAS_ROW:BIAS_ROW + 1, :] + x_ref[0] * slab_ref[0:1, :]
    acc1 = x_ref[1] * slab_ref[1:2, :]
    acc2 = x_ref[2] * slab_ref[2:3, :]
    acc3 = x_ref[3] * slab_ref[3:4, :]
    for ci in range(4, IN_CH, 4):                              # static unroll: ci = 4, 8
        acc0 = acc0 + x_ref[ci + 0] * slab_ref[ci + 0:ci + 1, :]
        acc1 = acc1 + x_ref[ci + 1] * slab_ref[ci + 1:ci + 2, :]
        acc2 = acc2 + x_ref[ci + 2] * slab_ref[ci + 2:ci + 3, :]
        acc3 = acc3 + x_ref[ci + 3] * slab_ref[ci + 3:ci + 4, :]
    acc = (acc0 + acc1) + (acc2 + acc3)                        # (1, 128)
    gate = slab_ref[GATE_ROW:GATE_ROW + IN_CH, :]              # (12, 128) precomputed erf gate
    o_ref[...] = acc * gate                                    # broadcast (1,128) * (12,128)


_single_cost = pl.CostEstimate(
    flops=2 * IN_CH * LANES + IN_CH * LANES,
    transcendentals=0,                                         # erf precomputed outside the kernel
    bytes_accessed=(IN_CH + SLAB_ROWS * LANES + IN_CH * LANES) * 4,
)

_single_call = pl.pallas_call(
    _single_kernel,
    out_shape=jax.ShapeDtypeStruct((IN_CH, LANES), jnp.float32),
    in_specs=[
        pl.BlockSpec(memory_space=pltpu.MemorySpace.SMEM),     # x: 12 scalars
        pl.BlockSpec(memory_space=pltpu.MemorySpace.VMEM),     # packed weight/bias/gate slab
    ],
    out_specs=pl.BlockSpec(memory_space=pltpu.MemorySpace.VMEM),
    cost_estimate=_single_cost,
)


@jax.jit
def model_forward(x, slab):
    """x: (1, 12, 1, 1) NCHW;  slab: (32, 128) packed params.  Returns (12, 24, 2, 2)."""
    n, cin, h, w = x.shape
    assert (n, cin, h, w) == (1, IN_CH, 1, 1), "v1 * v6 only broadcasts for N=1, H=W=1"
    x_vec = x.reshape(cin).astype(jnp.float32)
    out = _single_call(x_vec, slab)                            # (12, 128) lane-dense
    return out[:, :FLAT].reshape(IN_CH, OUT_CH, K, K)          # matches PyTorch broadcast result


# ----------------------------------------------------------------------------- batched kernel
def _batched_kernel(x_ref, slab_ref, o_ref):
    """One grid step handles TB independent forward calls (amortizes launch/DMA cost).

    x_ref:    VMEM (TB, 12) f32 — TB input pixels.
    slab_ref: VMEM (32, 128) f32 — packed params, resident across the grid (constant index_map).
    o_ref:    VMEM (TB, 12, 128) f32.
    """
    w = slab_ref[0:IN_CH, :]                                   # (12, 128)
    b = slab_ref[BIAS_ROW:BIAS_ROW + 1, :]                     # (1, 128)
    gate = slab_ref[GATE_ROW:GATE_ROW + IN_CH, :]              # (12, 128)
    acc = jnp.dot(x_ref[...], w,                               # (TB, 128) — M>1, use the MXU
                  preferred_element_type=jnp.float32,
                  precision=jax.lax.Precision.HIGHEST) + b
    o_ref[...] = acc[:, None, :] * gate[None, :, :]            # (TB, 12, 128)


def _make_batched_call(b_padded):
    n_tiles = b_padded // TB
    cost = pl.CostEstimate(
        flops=b_padded * (2 * IN_CH * LANES + IN_CH * LANES),
        transcendentals=0,
        bytes_accessed=(b_padded * IN_CH + SLAB_ROWS * LANES + b_padded * IN_CH * LANES) * 4,
    )
    return pl.pallas_call(
        _batched_kernel,
        out_shape=jax.ShapeDtypeStruct((b_padded, IN_CH, LANES), jnp.float32),
        grid_spec=pltpu.PrefetchScalarGridSpec(
            num_scalar_prefetch=0,
            grid=(n_tiles,),
            in_specs=[
                pl.BlockSpec((TB, IN_CH), lambda i: (i, 0)),           # batch tile of inputs
                pl.BlockSpec((SLAB_ROWS, LANES), lambda i: (0, 0)),    # slab: DMA'd once, resident
            ],
            out_specs=pl.BlockSpec((TB, IN_CH, LANES), lambda i: (i, 0, 0)),
        ),
        compiler_params=pltpu.CompilerParams(
            dimension_semantics=("parallel",)),                # v7x: both TCs split the batch
        cost_estimate=cost,
    )


@jax.jit
def model_forward_batched(xs, slab):
    """xs: (B, 12) — B independent single-pixel forward calls in one pallas_call.

    Returns (B, 12, 24, 2, 2): out[b] == model_forward(xs[b].reshape(1,12,1,1), slab).
    """
    B = xs.shape[0]
    b_padded = TB * ((B + TB - 1) // TB)
    xs_p = jnp.pad(xs.astype(jnp.float32), ((0, b_padded - B), (0, 0)))
    out = _make_batched_call(b_padded)(xs_p, slab)             # (Bp, 12, 128)
    return out[:B, :, :FLAT].reshape(B, IN_CH, OUT_CH, K, K)


# ----------------------------------------------------------------------------- pure-JAX reference
def _reference(x, weight, bias):
    """Pure-JAX reference of the PyTorch forward (same special-case shapes)."""
    n, cin, h, w = x.shape
    cout = weight.shape[1]
    w_mat = weight.reshape(cin, cout * K * K)
    v1 = (jnp.dot(x.reshape(n, cin), w_mat, precision=jax.lax.Precision.HIGHEST)
          + jnp.repeat(bias, K * K)[None, :]).reshape(n, cout, K, K)
    v6 = jax.scipy.special.erf(weight * SQRT_HALF) + 0.5
    return v1 * v6          # broadcast (1, Cout, 2, 2) * (Cin, Cout, 2, 2) -> (Cin, Cout, 2, 2)


if __name__ == "__main__":
    key = jax.random.PRNGKey(0)
    kx, kw_, kb_, kxb = jax.random.split(key, 4)

    # Deterministic ConvTranspose2d parameters (PyTorch weight layout: (in_ch, out_ch, kH, kW)).
    fan = IN_CH * K * K
    bound = 1.0 / (fan ** 0.5)
    weight = jax.random.uniform(kw_, (IN_CH, OUT_CH, K, K), jnp.float32, -bound, bound)
    bias = jax.random.uniform(kb_, (OUT_CH,), jnp.float32, -bound, bound)

    # One-time parameter packing (erf gate, bias row, flattened weights) into the aligned slab.
    slab = jax.block_until_ready(make_fused_params(weight, bias))

    # --- single-call path (the module's forward for an N=1, H=W=1 input) ---
    x1 = jax.random.normal(kx, (1, IN_CH, 1, 1), dtype=jnp.float32)
    out1 = jax.block_until_ready(model_forward(x1, slab))
    ref1 = _reference(x1, weight, bias)
    assert out1.shape == (IN_CH, OUT_CH, K, K), out1.shape
    assert jnp.allclose(out1, ref1, atol=2e-5, rtol=2e-5), float(jnp.max(jnp.abs(out1 - ref1)))

    # --- batched path: 16 independent forward calls amortized into one pallas_call (MXU) ---
    B = 16
    xs = jax.random.normal(kxb, (B, IN_CH), dtype=jnp.float32)
    outb = jax.block_until_ready(model_forward_batched(xs, slab))
    refb = jax.vmap(lambda v: _reference(v.reshape(1, IN_CH, 1, 1), weight, bias))(xs)
    assert outb.shape == (B, IN_CH, OUT_CH, K, K), outb.shape
    assert jnp.allclose(outb, refb, atol=2e-5, rtol=2e-5), float(jnp.max(jnp.abs(outb - refb)))

    print("KERNEL_OK")
</pallas_src>

<mosaic_0001>
module attributes {stable_mosaic.version = 11 : i64} {
  func.func @_single_kernel(%arg0: memref<12xf32, #tpu.memory_space<smem>>, %arg1: memref<32x128xf32, #tpu.memory_space<vmem>>, %arg2: memref<12x128xf32, #tpu.memory_space<vmem>>) attributes {dimension_semantics = [], scalar_prefetch = 0 : i64, scratch_operands = 0 : i64, tpu.core_type = #tpu.core_type<tc>} {
    %c12 = arith.constant 12 : index
    %c0 = arith.constant 0 : index
    %0 = vector.load %arg1[%c12, %c0] : memref<32x128xf32, #tpu.memory_space<vmem>>, vector<1x128xf32>
    %c0_0 = arith.constant 0 : index
    %1 = memref.load %arg0[%c0_0] : memref<12xf32, #tpu.memory_space<smem>>
    %c0_1 = arith.constant 0 : index
    %c0_2 = arith.constant 0 : index
    %2 = vector.load %arg1[%c0_1, %c0_2] : memref<32x128xf32, #tpu.memory_space<vmem>>, vector<1x128xf32>
    %3 = vector.broadcast %1 : f32 to vector<1x128xf32>
    %4 = arith.mulf %3, %2 : vector<1x128xf32>
    %5 = arith.addf %0, %4 : vector<1x128xf32>
    %c1 = arith.constant 1 : index
    %6 = memref.load %arg0[%c1] : memref<12xf32, #tpu.memory_space<smem>>
    %c1_3 = arith.constant 1 : index
    %c0_4 = arith.constant 0 : index
    %7 = vector.load %arg1[%c1_3, %c0_4] : memref<32x128xf32, #tpu.memory_space<vmem>>, vector<1x128xf32>
    %8 = vector.broadcast %6 : f32 to vector<1x128xf32>
    %9 = arith.mulf %8, %7 : vector<1x128xf32>
    %c2 = arith.constant 2 : index
    %10 = memref.load %arg0[%c2] : memref<12xf32, #tpu.memory_space<smem>>
    %c2_5 = arith.constant 2 : index
    %c0_6 = arith.constant 0 : index
    %11 = vector.load %arg1[%c2_5, %c0_6] : memref<32x128xf32, #tpu.memory_space<vmem>>, vector<1x128xf32>
    %12 = vector.broadcast %10 : f32 to vector<1x128xf32>
    %13 = arith.mulf %12, %11 : vector<1x128xf32>
    %c3 = arith.constant 3 : index
    %14 = memref.load %arg0[%c3] : memref<12xf32, #tpu.memory_space<smem>>
    %c3_7 = arith.constant 3 : index
    %c0_8 = arith.constant 0 : index
    %15 = vector.load %arg1[%c3_7, %c0_8] : memref<32x128xf32, #tpu.memory_space<vmem>>, vector<1x128xf32>
    %16 = vector.broadcast %14 : f32 to vector<1x128xf32>
    %17 = arith.mulf %16, %15 : vector<1x128xf32>
    %c4 = arith.constant 4 : index
    %18 = memref.load %arg0[%c4] : memref<12xf32, #tpu.memory_space<smem>>
    %c4_9 = arith.constant 4 : index
    %c0_10 = arith.constant 0 : index
    %19 = vector.load %arg1[%c4_9, %c0_10] : memref<32x128xf32, #tpu.memory_space<vmem>>, vector<1x128xf32>
    %20 = vector.broadcast %18 : f32 to vector<1x128xf32>
    %21 = arith.mulf %20, %19 : vector<1x128xf32>
    %22 = arith.addf %5, %21 : vector<1x128xf32>
    %c5 = arith.constant 5 : index
    %23 = memref.load %arg0[%c5] : memref<12xf32, #tpu.memory_space<smem>>
    %c5_11 = arith.constant 5 : index
    %c0_12 = arith.constant 0 : index
    %24 = vector.load %arg1[%c5_11, %c0_12] : memref<32x128xf32, #tpu.memory_space<vmem>>, vector<1x128xf32>
    %25 = vector.broadcast %23 : f32 to vector<1x128xf32>
    %26 = arith.mulf %25, %24 : vector<1x128xf32>
    %27 = arith.addf %9, %26 : vector<1x128xf32>
    %c6 = arith.constant 6 : index
    %28 = memref.load %arg0[%c6] : memref<12xf32, #tpu.memory_space<smem>>
    %c6_13 = arith.constant 6 : index
    %c0_14 = arith.constant 0 : index
    %29 = vector.load %arg1[%c6_13, %c0_14] : memref<32x128xf32, #tpu.memory_space<vmem>>, vector<1x128xf32>
    %30 = vector.broadcast %28 : f32 to vector<1x128xf32>
    %31 = arith.mulf %30, %29 : vector<1x128xf32>
    %32 = arith.addf %13, %31 : vector<1x128xf32>
    %c7 = arith.constant 7 : index
    %33 = memref.load %arg0[%c7] : memref<12xf32, #tpu.memory_space<smem>>
    %c7_15 = arith.constant 7 : index
    %c0_16 = arith.constant 0 : index
    %34 = vector.load %arg1[%c7_15, %c0_16] : memref<32x128xf32, #tpu.memory_space<vmem>>, vector<1x128xf32>
    %35 = vector.broadcast %33 : f32 to vector<1x128xf32>
    %36 = arith.mulf %35, %34 : vector<1x128xf32>
    %37 = arith.addf %17, %36 : vector<1x128xf32>
    %c8 = arith.constant 8 : index
    %38 = memref.load %arg0[%c8] : memref<12xf32, #tpu.memory_space<smem>>
    %c8_17 = arith.constant 8 : index
    %c0_18 = arith.constant 0 : index
    %39 = vector.load %arg1[%c8_17, %c0_18] : memref<32x128xf32, #tpu.memory_space<vmem>>, vector<1x128xf32>
    %40 = vector.broadcast %38 : f32 to vector<1x128xf32>
    %41 = arith.mulf %40, %39 : vector<1x128xf32>
    %42 = arith.addf %22, %41 : vector<1x128xf32>
    %c9 = arith.constant 9 : index
    %43 = memref.load %arg0[%c9] : memref<12xf32, #tpu.memory_space<smem>>
    %c9_19 = arith.constant 9 : index
    %c0_20 = arith.constant 0 : index
    %44 = vector.load %arg1[%c9_19, %c0_20] : memref<32x128xf32, #tpu.memory_space<vmem>>, vector<1x128xf32>
    %45 = vector.broadcast %43 : f32 to vector<1x128xf32>
    %46 = arith.mulf %45, %44 : vector<1x128xf32>
    %47 = arith.addf %27, %46 : vector<1x128xf32>
    %c10 = arith.constant 10 : index
    %48 = memref.load %arg0[%c10] : memref<12xf32, #tpu.memory_space<smem>>
    %c10_21 = arith.constant 10 : index
    %c0_22 = arith.constant 0 : index
    %49 = vector.load %arg1[%c10_21, %c0_22] : memref<32x128xf32, #tpu.memory_space<vmem>>, vector<1x128xf32>
    %50 = vector.broadcast %48 : f32 to vector<1x128xf32>
    %51 = arith.mulf %50, %49 : vector<1x128xf32>
    %52 = arith.addf %32, %51 : vector<1x128xf32>
    %c11 = arith.constant 11 : index
    %53 = memref.load %arg0[%c11] : memref<12xf32, #tpu.memory_space<smem>>
    %c11_23 = arith.constant 11 : index
    %c0_24 = arith.constant 0 : index
    %54 = vector.load %arg1[%c11_23, %c0_24] : memref<32x128xf32, #tpu.memory_space<vmem>>, vector<1x128xf32>
    %55 = vector.broadcast %53 : f32 to vector<1x128xf32>
    %56 = arith.mulf %55, %54 : vector<1x128xf32>
    %57 = arith.addf %37, %56 : vector<1x128xf32>
    %58 = arith.addf %42, %47 : vector<1x128xf32>
    %59 = arith.addf %52, %57 : vector<1x128xf32>
    %60 = arith.addf %58, %59 : vector<1x128xf32>
    %c16 = arith.constant 16 : index
    %c0_25 = arith.constant 0 : index
    %61 = vector.load %arg1[%c16, %c0_25] : memref<32x128xf32, #tpu.memory_space<vmem>>, vector<12x128xf32>
    %62 = vector.broadcast %60 : vector<1x128xf32> to vector<12x128xf32>
    %63 = arith.mulf %62, %61 : vector<12x128xf32>
    %c0_26 = arith.constant 0 : index
    %c0_27 = arith.constant 0 : index
    %64 = vector.load %arg2[%c0_26, %c0_27] : memref<12x128xf32, #tpu.memory_space<vmem>>, vector<12x128xf32>
    tpu.vector_store %arg2[%c0_26, %c0_27], %63 {strides = array<i32>} : memref<12x128xf32, #tpu.memory_space<vmem>>, vector<12x128xf32>,
    return
  }
}

</mosaic_0001>

<bundles_post_ra>
// kernel: model_forward.1
= control target key start
LH: loop header
LB: loop body
LE: loop exit
PB: predicated region body
PF: predicated region fallthrough
CT: control target
= control target key end

     0   :  { %7 = vsyncpa [#allocation4], 0  ;;  %s197_s0 = inlined_call_operand.vmem [shape: f32[12], index: 0, kind: input, shape index: {}]   ;;  %s198_s1 = inlined_call_operand.hbm [shape: f32[32,128], index: 1, kind: input, shape index: {}]   ;;  %s199_s2 = inlined_call_operand.vmem [shape: f32[12,128], index: 2, kind: output, shape index: {}]  }
   0x1   :  { %s15_s11 = sshll.u32 %s197_s0, 4  ;;  %s16_s11 = int_to_ptr.vmem [resolvable:$true] %s15_s11 }
   0x2   :  { %8 = vsyncpa [#allocation3], 0  ;;  %s130_s12 = scalar_lea.vmem %s16_s11, 16  ;;  %p135_p1 = scmp.lt.s32.totalorder %s16_s11, %s16_s11 }
   0x3   :  { %p131_p0 = scmp.ne.s32.totalorder %s16_s11, %s130_s12  ;;  %p136_p2 = scmp.lt.s32.totalorder %s130_s12, %s130_s12 }
   0x5   :  { %p137_p3 = por %p136_p2, %p135_p1 }
   0x7   :  { %p138_p4 = pnand %p137_p3, %p131_p0 }
   0x9   :  { %141 = shalt.err (!%p138_p4)
}
   0xa   :  { %s166_s13 = smov [#allocation2]   ;;  %s167_s14 = smov [#allocation5]  }
   0xb   :  { %18 = dma.vmem_to_smem %s16_s11, 16, %s166_s13, [#allocation4]  }
   0xc   :  { %s24_s15 = sshll.u32 %s167_s14, 4  ;;  %s25_s15 = int_to_ptr.vmem [resolvable:$true] %s24_s15 }
   0xd   :  { %s150_s16 = scalar_lea.vmem %s25_s15, 512  ;;  %p155_p6 = scmp.lt.s32.totalorder %s25_s15, %s25_s15 }
   0xe   :  { %p151_p5 = scmp.ne.s32.totalorder %s25_s15, %s150_s16  ;;  %p156_p7 = scmp.lt.s32.totalorder %s150_s16, %s150_s16 }
  0x10   :  { %p157_p8 = por %p156_p7, %p155_p6 }
  0x12   :  { %p158_p9 = pnand %p157_p8, %p151_p5 }
  0x14   :  { %161 = shalt.err (!%p158_p9)
}
  0x15   :  { %s168_s0 = smov 128   ;;  %s169_s17 = smov 8  }
  0x16   :  { %30 = dma.hbm_to_vmem [thread:$0]  %s198_s1, 512, %s25_s15, [#allocation3], %s168_s0, %s168_s0, %s169_s17  }
  0x17   :  { %162 = dma.done.wait [#allocation4], 16  }
  0x18   :  { %163 = vsyncadd [#allocation4], 4294967280 }
  0x19   :  { %164 = dma.done.wait [#allocation3], 512  }
  0x1a   :  { %165 = vsyncadd [#allocation3], 4294966784 }
  0x1b   :  { %37 = sfence }
  0x1c   :  { %s39_s20 = sld [smem:[#allocation2]]  ;;  %v40_v0 = vld [vmem:[#allocation5] sm:$0x1]  ;;  %v38_v1 = vld [vmem:[#allocation5 + $0xc] sm:$0x1]  ;;  %v101_v32 = vlaneseq  ;;  %v99_v52 = vld [vmem:[#allocation5 + $0x10] sm:$0xff] }
  0x1d   :  { %s115_s21 = sld [smem:[#allocation2 + $0x1]]  ;;  %v45_v4 = vld [vmem:[#allocation5 + $0x1] sm:$0x1]  ;;  %v49_v6 = vld [vmem:[#allocation5 + $0x2] sm:$0x1] }
  0x1e   :  { %s116_s22 = sld [smem:[#allocation2 + $0x2]]  ;;  %v57_v8 = vld [vmem:[#allocation5 + $0x4] sm:$0x1]  ;;  %v53_v10 = vld [vmem:[#allocation5 + $0x3] sm:$0x1]  ;;  %v102_v45 = vshrl.u32 %v101_v32, 7 }
  0x1f   :  { %s117_s23 = sld [smem:[#allocation2 + $0x3]]  ;;  %v62_v12 = vld [vmem:[#allocation5 + $0x5] sm:$0x1]  ;;  %v67_v15 = vld [vmem:[#allocation5 + $0x6] sm:$0x1] }
  0x20   :  { %s118_s24 = sld [smem:[#allocation2 + $0x4]]  ;;  %v72_v19 = vld [vmem:[#allocation5 + $0x7] sm:$0x1]  ;;  %v77_v23 = vld [vmem:[#allocation5 + $0x8] sm:$0x1]  ;;  %v103_v50 = vsub.s32 0, %v102_v45 }
  0x21   :  { %s119_s25 = sld [smem:[#allocation2 + $0x5]]  ;;  %v82_v27 = vld [vmem:[#allocation5 + $0x9] sm:$0x1]  ;;  %v87_v31 = vld [vmem:[#allocation5 + $0xa] sm:$0x1] }
  0x22   :  { %v41_v2 = vstv %s39_s20  ;;  %s120_s26 = sld [smem:[#allocation2 + $0x6]]  ;;  %v92_v36 = vld [vmem:[#allocation5 + $0xb] sm:$0x1]  ;;  %v100_v53 = vld [vmem:[#allocation5 + $0x18] sm:$0xf] }
  0x23   :  { %v42_v3 = vmul.f32 %v41_v2, %v40_v0  ;;  %v46_v5 = vstv %s115_s21  ;;  %s121_s27 = sld [smem:[#allocation2 + $0x7]] }
  0x24   :  { %v50_v7 = vstv %s116_s22  ;;  %s122_s1 = sld [smem:[#allocation2 + $0x8]]  ;;  %v47_v13 = vmul.f32 %v46_v5, %v45_v4 }
  0x25   :  { %v43_v9 = vadd.f32 %v42_v3, %v38_v1  ;;  %v54_v11 = vstv %s117_s23  ;;  %s123_s28 = sld [smem:[#allocation2 + $0x9]]  ;;  %v51_v16 = vmul.f32 %v50_v7, %v49_v6 }
  0x26   :  { %v58_v14 = vstv %s118_s24  ;;  %s124_s29 = sld [smem:[#allocation2 + $0xa]]  ;;  %v55_v20 = vmul.f32 %v54_v11, %v53_v10 }
  0x27   :  { %v59_v17 = vmul.f32 %v58_v14, %v57_v8  ;;  %v63_v18 = vstv %s119_s25  ;;  %s125_s30 = sld [smem:[#allocation2 + $0xb]] }
  0x28   :  { %v64_v21 = vmul.f32 %v63_v18, %v62_v12  ;;  %v68_v22 = vstv %s120_s26 }
  0x29   :  { %v60_v24 = vadd.f32 %v59_v17, %v43_v9  ;;  %v69_v25 = vmul.f32 %v68_v22, %v67_v15  ;;  %v73_v26 = vstv %s121_s27 }
  0x2a   :  { %v65_v28 = vadd.f32 %v64_v21, %v47_v13  ;;  %v74_v29 = vmul.f32 %v73_v26, %v72_v19  ;;  %v78_v30 = vstv %s122_s1 }
  0x2b   :  { %v70_v33 = vadd.f32 %v69_v25, %v51_v16  ;;  %v79_v34 = vmul.f32 %v78_v30, %v77_v23  ;;  %v83_v35 = vstv %s123_s28 }
  0x2c   :  { %v75_v37 = vadd.f32 %v74_v29, %v55_v20  ;;  %v84_v38 = vmul.f32 %v83_v35, %v82_v27  ;;  %v88_v39 = vstv %s124_s29 }
  0x2d   :  { %v80_v40 = vadd.f32 %v79_v34, %v60_v24  ;;  %v89_v41 = vmul.f32 %v88_v39, %v87_v31  ;;  %v93_v42 = vstv %s125_s30 }
  0x2e   :  { %v85_v43 = vadd.f32 %v84_v38, %v65_v28  ;;  %v94_v44 = vmul.f32 %v93_v42, %v92_v36 }
  0x2f   :  { %v90_v46 = vadd.f32 %v89_v41, %v70_v33 }
  0x30   :  { %v95_v47 = vadd.f32 %v94_v44, %v75_v37  ;;  %v96_v48 = vadd.f32 %v85_v43, %v80_v40 }
  0x32   :  { %v97_v49 = vadd.f32 %v95_v47, %v90_v46 }
  0x34   :  { %v98_v51 = vadd.f32 %v97_v49, %v96_v48 }
  0x36   :  { %v104_v54 = vrot.slane %v98_v51, %v103_v50 }
  0x38   :  { %v105_v55 = vmul.f32 %v104_v54, %v99_v52  ;;  %v106_v56 = vmul.f32 %v104_v54, %v100_v53 }
  0x3a   :  { %107 = vst [vmem:[%s199_s2] sm:$0xff] %v105_v55  ;;  %108 = vst [vmem:[%s199_s2 + $0x8] sm:$0xf] %v106_v56 }
  0x3b   :  { %113 = vsyncpa [#allocation3], 1 }
  0x3c   :  { %114 = vsyncpa [#allocation4], 1 }

</bundles_post_ra>
